<compile_context>
chip_gen: v7x
topology: tpu7x:2x2x1
jax: 0.10.0
libtpu: 0.0.40
codegen_flags: <defaults>
</compile_context>

<pallas_src>
import functools

import jax
import jax.numpy as jnp
from jax.experimental import pallas as pl
from jax.experimental.pallas import tpu as pltpu

ALPHA = 0.25
GAMMA = 2.0
LANES = 128
MAX_ROW_BLOCK = 1024  # 1024*128*4 B = 512 KiB/input block; x2 inputs x2 buffers ~ 2 MiB


def _round_up(x, m):
    return (x + m - 1) // m * m


def _focal_loss_kernel(p_ref, t_ref, out_ref, *, alpha, gamma):
    p = p_ref[...].astype(jnp.float32)
    t = t_ref[...].astype(jnp.float32)

    # Full PyTorch BCELoss formula with the -100 log clamp (works for soft
    # targets, and the clamp keeps padded elements (p=1, t=1) finite/zero).
    log_p = jnp.maximum(jnp.log(p), -100.0)         # EUP log
    log_1mp = jnp.maximum(jnp.log(1.0 - p), -100.0)  # EUP log
    bce = -(t * log_p + (1.0 - t) * log_1mp)
    pt = jnp.exp(-bce)                               # EUP exp
    one_m_pt = 1.0 - pt

    g = float(gamma)
    if g == 2.0:
        mod = one_m_pt * one_m_pt                    # VALU square, no pow on EUP
    elif g.is_integer() and g >= 0.0:
        mod = jnp.ones_like(one_m_pt)
        for _ in range(int(g)):
            mod = mod * one_m_pt
    else:
        mod = jnp.power(one_m_pt, g)                 # non-integer gamma fallback

    focal = alpha * mod * bce
    # Per-block partial sum over sublanes -> lane-dense (1, 128) output row.
    out_ref[...] = jnp.sum(focal, axis=0, keepdims=True)


def focal_loss(inputs, targets, alpha=ALPHA, gamma=GAMMA):
    """inputs: (N,1) or (N,) probabilities in (0,1); targets: (N,) in [0,1].

    Returns the scalar mean focal loss (reduction='mean'), matching the
    PyTorch FocalLoss module.
    """
    p = jnp.squeeze(inputs).astype(jnp.float32)
    t = jnp.asarray(targets).astype(jnp.float32)
    assert p.ndim == 1 and p.shape == t.shape, (p.shape, t.shape)
    n_total = p.shape[0]

    rows_needed = -(-n_total // LANES)
    row_block = min(MAX_ROW_BLOCK, _round_up(rows_needed, 8))
    padded_rows = _round_up(rows_needed, row_block)
    total_padded = padded_rows * LANES
    num_blocks = padded_rows // row_block
    pad = total_padded - n_total

    # Pad with (p=1, t=1): bce = -(1*log(1) + 0*clamp(log 0)) = 0 -> focal = 0.
    p_flat = jnp.pad(p, (0, pad), constant_values=1.0)
    t_flat = jnp.pad(t, (0, pad), constant_values=1.0)

    p2 = p_flat.reshape(padded_rows, LANES)
    t2 = t_flat.reshape(padded_rows, LANES)

    kernel = functools.partial(_focal_loss_kernel,
                               alpha=float(alpha), gamma=float(gamma))

    partial_sums = pl.pallas_call(
        kernel,
        out_shape=jax.ShapeDtypeStruct((num_blocks, LANES), jnp.float32),
        grid_spec=pltpu.PrefetchScalarGridSpec(
            num_scalar_prefetch=0,
            grid=(num_blocks,),
            in_specs=[
                pl.BlockSpec((row_block, LANES), lambda i: (i, 0)),
                pl.BlockSpec((row_block, LANES), lambda i: (i, 0)),
            ],
            out_specs=pl.BlockSpec((1, LANES), lambda i: (i, 0)),
        ),
        compiler_params=pltpu.CompilerParams(
            # Each grid step owns a distinct output block -> safe to shard
            # across the 2 TensorCores on v7x; no-op on single-TC v5e/v6e.
            dimension_semantics=("parallel",),
        ),
        cost_estimate=pl.CostEstimate(
            flops=12 * total_padded,
            transcendentals=3 * total_padded,
            bytes_accessed=4 * total_padded          # f32 probabilities in
                           + 4 * total_padded        # f32 targets in
                           + 4 * num_blocks * LANES,  # f32 partial sums out
        ),
    )(p2, t2)

    # Tiny finishing reduction + mean in plain JAX.
    return jnp.sum(partial_sums) / jnp.float32(n_total)


def _reference(inputs, targets, alpha=ALPHA, gamma=GAMMA):
    # Full PyTorch-equivalent formula (both log terms, -100 clamp).
    p = jnp.squeeze(inputs).astype(jnp.float32)
    t = targets.astype(jnp.float32)
    bce = -(t * jnp.maximum(jnp.log(p), -100.0)
            + (1.0 - t) * jnp.maximum(jnp.log(1.0 - p), -100.0))
    pt = jnp.exp(-bce)
    return jnp.mean(alpha * (1.0 - pt) ** gamma * bce)


if __name__ == "__main__":
    key = jax.random.PRNGKey(0)
    k1, k2 = jax.random.split(key)

    N = 2048  # batch of 2048 binary predictions, inputs shaped (N, 1)
    logits = jax.random.normal(k1, (N, 1), dtype=jnp.float32)
    inputs = jax.nn.sigmoid(logits)                        # probabilities in (0,1)
    targets = (jax.random.uniform(k2, (N,)) > 0.5).astype(jnp.float32)

    loss = focal_loss(inputs, targets)
    jax.block_until_ready(loss)

    ref = _reference(inputs, targets)
    assert jnp.allclose(loss, ref, rtol=1e-5, atol=1e-6), (loss, ref)

    print("KERNEL_OK")
</pallas_src>

<mosaic_0001>
module attributes {stable_mosaic.version = 11 : i64} {
  func.func @_focal_loss_kernel(%arg0: i32, %arg1: memref<16x128xf32, #tpu.memory_space<vmem>>, %arg2: memref<16x128xf32, #tpu.memory_space<vmem>>, %arg3: memref<1x128xf32, #tpu.memory_space<vmem>>) attributes {dimension_semantics = [#tpu.dimension_semantics<parallel>], iteration_bounds = array<i64: 1>, scalar_prefetch = 0 : i64, scratch_operands = 0 : i64, tpu.core_type = #tpu.core_type<tc>, window_params = [{transform_indices = @transform_0, window_bounds = array<i64: 16, 128>}, {transform_indices = @transform_1, window_bounds = array<i64: 16, 128>}, {transform_indices = @transform_2, window_bounds = array<i64: 1, 128>}]} {
    %c0 = arith.constant 0 : index
    %c0_0 = arith.constant 0 : index
    %0 = vector.load %arg1[%c0, %c0_0] : memref<16x128xf32, #tpu.memory_space<vmem>>, vector<16x128xf32>
    %c0_1 = arith.constant 0 : index
    %c0_2 = arith.constant 0 : index
    %1 = vector.load %arg2[%c0_1, %c0_2] : memref<16x128xf32, #tpu.memory_space<vmem>>, vector<16x128xf32>
    %2 = math.log %0 : vector<16x128xf32>
    %cst = arith.constant -1.000000e+02 : f32
    %3 = vector.broadcast %cst : f32 to vector<16x128xf32>
    %4 = arith.maximumf %2, %3 : vector<16x128xf32>
    %cst_3 = arith.constant 1.000000e+00 : f32
    %5 = vector.broadcast %cst_3 : f32 to vector<16x128xf32>
    %6 = arith.subf %5, %0 : vector<16x128xf32>
    %7 = math.log %6 : vector<16x128xf32>
    %cst_4 = arith.constant -1.000000e+02 : f32
    %8 = vector.broadcast %cst_4 : f32 to vector<16x128xf32>
    %9 = arith.maximumf %7, %8 : vector<16x128xf32>
    %10 = arith.mulf %1, %4 : vector<16x128xf32>
    %cst_5 = arith.constant 1.000000e+00 : f32
    %11 = vector.broadcast %cst_5 : f32 to vector<16x128xf32>
    %12 = arith.subf %11, %1 : vector<16x128xf32>
    %13 = arith.mulf %12, %9 : vector<16x128xf32>
    %14 = arith.addf %10, %13 : vector<16x128xf32>
    %cst_6 = arith.constant 0.000000e+00 : f32
    %15 = vector.broadcast %cst_6 : f32 to vector<16x128xf32>
    %16 = arith.subf %15, %14 : vector<16x128xf32>
    %cst_7 = arith.constant 0.000000e+00 : f32
    %17 = vector.broadcast %cst_7 : f32 to vector<16x128xf32>
    %18 = arith.subf %17, %16 : vector<16x128xf32>
    %19 = math.exp %18 : vector<16x128xf32>
    %cst_8 = arith.constant 1.000000e+00 : f32
    %20 = vector.broadcast %cst_8 : f32 to vector<16x128xf32>
    %21 = arith.subf %20, %19 : vector<16x128xf32>
    %22 = arith.mulf %21, %21 : vector<16x128xf32>
    %cst_9 = arith.constant 2.500000e-01 : f32
    %23 = vector.broadcast %cst_9 : f32 to vector<16x128xf32>
    %24 = arith.mulf %23, %22 : vector<16x128xf32>
    %25 = arith.mulf %24, %16 : vector<16x128xf32>
    %cst_10 = arith.constant dense<0.000000e+00> : vector<128xf32>
    %26 = vector.multi_reduction <add>, %25, %cst_10 [0] : vector<16x128xf32> to vector<128xf32>
    %27 = vector.shape_cast %26 : vector<128xf32> to vector<1x128xf32>
    %c0_11 = arith.constant 0 : index
    %c0_12 = arith.constant 0 : index
    %28 = vector.load %arg3[%c0_11, %c0_12] : memref<1x128xf32, #tpu.memory_space<vmem>>, vector<1x128xf32>
    tpu.vector_store %arg3[%c0_11, %c0_12], %27 {strides = array<i32>} : memref<1x128xf32, #tpu.memory_space<vmem>>, vector<1x128xf32>,
    return
  }
  func.func @transform_0(%arg0: i32) -> (i32, i32) {
    %c0_i32 = arith.constant 0 : i32
    %c0_i32_0 = arith.constant 0 : i32
    return %arg0, %c0_i32 : i32, i32
  }
  func.func @transform_1(%arg0: i32) -> (i32, i32) {
    %c0_i32 = arith.constant 0 : i32
    %c0_i32_0 = arith.constant 0 : i32
    return %arg0, %c0_i32 : i32, i32
  }
  func.func @transform_2(%arg0: i32) -> (i32, i32) {
    %c0_i32 = arith.constant 0 : i32
    %c0_i32_0 = arith.constant 0 : i32
    return %arg0, %c0_i32 : i32, i32
  }
}

</mosaic_0001>

<bundles_post_ra>
// kernel: tpu_custom_call.1
= control target key start
LH: loop header
LB: loop body
LE: loop exit
PB: predicated region body
PF: predicated region fallthrough
CT: control target
= control target key end

     0   :  { %7 = vsyncpa [#allocation3], 0  ;;  %s251_s0 = inlined_call_operand.hbm [shape: f32[16,128], index: 0, kind: input, shape index: {}]   ;;  %s252_s1 = inlined_call_operand.hbm [shape: f32[16,128], index: 1, kind: input, shape index: {}]   ;;  %s253_s2 = inlined_call_operand.hbm [shape: f32[1,128], index: 2, kind: output, shape index: {}]  }
   0x1   :  { %8 = vsyncpa [#allocation6], 0 }
   0x2   :  { %9 = vsyncpa [#allocation4], 0  ;;  %s195_s9 = smov [#allocation2]   ;;  %s123_s13 = scalar_lea.hbm %s251_s0, 256 }
   0x3   :  { %s15_s10 = sshll.u32 %s195_s9, 4  ;;  %p124_p0 = scmp.ne.s32.totalorder %s251_s0, %s123_s13  ;;  %s16_s10 = int_to_ptr.vmem [resolvable:$true] %s15_s10 }
   0x4   :  { %p127_p1 = scmp.lt.u32.totalorder %s123_s13, %s251_s0 }
   0x6   :  { %p129_p2 = pnand %p127_p1, %p124_p0 }
   0x8   :  { %132 = shalt.err (!%p129_p2)
}
   0x9   :  { %s133_s18 = scalar_lea.vmem %s16_s10, 256  ;;  %p138_p4 = scmp.lt.s32.totalorder %s16_s10, %s16_s10 }
   0xa   :  { %p134_p3 = scmp.ne.s32.totalorder %s16_s10, %s133_s18  ;;  %p139_p5 = scmp.lt.s32.totalorder %s133_s18, %s133_s18 }
   0xc   :  { %p140_p6 = por %p139_p5, %p138_p4 }
   0xe   :  { %p141_p7 = pnand %p140_p6, %p134_p3 }
  0x10   :  { %144 = shalt.err (!%p141_p7)
}
  0x11   :  { %s196_s19 = smov 128   ;;  %s197_s20 = smov 8  }
  0x12   :  { %21 = dma.hbm_to_vmem [thread:$0]  %s251_s0, 256, %s16_s10, [#allocation3], %s196_s19, %s196_s19, %s197_s20  }
  0x13   :  { %s198_s23 = smov [#allocation5]   ;;  %s145_s27 = scalar_lea.hbm %s252_s1, 256 }
  0x14   :  { %s27_s24 = sshll.u32 %s198_s23, 4  ;;  %p146_p8 = scmp.ne.s32.totalorder %s252_s1, %s145_s27  ;;  %s28_s24 = int_to_ptr.vmem [resolvable:$true] %s27_s24 }
  0x15   :  { %p149_p9 = scmp.lt.u32.totalorder %s145_s27, %s252_s1 }
  0x17   :  { %p151_p10 = pnand %p149_p9, %p146_p8 }
  0x19   :  { %154 = shalt.err (!%p151_p10)
}
  0x1a   :  { %s155_s4 = scalar_lea.vmem %s28_s24, 256  ;;  %p160_p12 = scmp.lt.s32.totalorder %s28_s24, %s28_s24 }
  0x1b   :  { %p156_p11 = scmp.ne.s32.totalorder %s28_s24, %s155_s4  ;;  %p161_p13 = scmp.lt.s32.totalorder %s155_s4, %s155_s4 }
  0x1d   :  { %p162_p0 = por %p161_p13, %p160_p12 }
  0x1f   :  { %p163_p1 = pnand %p162_p0, %p156_p11 }
  0x21   :  { %166 = shalt.err (!%p163_p1)
}
  0x22   :  { %33 = dma.hbm_to_vmem [thread:$0]  %s252_s1, 256, %s28_s24, [#allocation6], %s196_s19, %s196_s19, %s197_s20  }
  0x23   :  { %189 = dma.done.wait [#allocation3], 256  }
  0x24   :  { %190 = vsyncadd [#allocation3], 4294967040 }
  0x25   :  { %191 = dma.done.wait [#allocation6], 256  }
  0x26   :  { %192 = vsyncadd [#allocation6], 4294967040  ;;  %v40_v0 = vld [vmem:[#allocation2] sm:$0xff]  ;;  %v41_v1 = vld [vmem:[#allocation2 + $0x8] sm:$0xff]  ;;  %s199_s1 = smov [#allocation7]  }
  0x27   :  { %111 = vlog2.f32 %v40_v0  ;;  %v50_v2 = vsub.f32 1.0, %v40_v0  ;;  %v51_v3 = vsub.f32 1.0, %v41_v1  ;;  %v42_v5 = vld [vmem:[#allocation5] sm:$0xff]  ;;  %v43_v7 = vld [vmem:[#allocation5 + $0x8] sm:$0xff]  ;;  %s96_s6 = sshll.u32 %s199_s1, 4  ;;  %s97_s6 = int_to_ptr.vmem [resolvable:$true] %s96_s6 }
  0x28   :  { %113 = vlog2.f32 %v41_v1  ;;  %v60_v14 = vsub.f32 1.0, %v42_v5  ;;  %v61_v17 = vsub.f32 1.0, %v43_v7  ;;  %s167_s7 = scalar_lea.vmem %s97_s6, 16  ;;  %s171_s8 = scalar_lea.vmem %s97_s6, 32 }
  0x29   :  { %115 = vlog2.f32 %v50_v2  ;;  %p168_p2 = scmp.ne.s32.totalorder %s97_s6, %s167_s7  ;;  %p172_p3 = scmp.lt.s32.totalorder %s97_s6, %s97_s6 }
  0x2a   :  { %117 = vlog2.f32 %v51_v3  ;;  %p173_p4 = scmp.lt.s32.totalorder %s171_s8, %s167_s7 }
  0x2c   :  { %p174_p5 = por %p173_p4, %p172_p3 }
  0x2e   :  { %p175_p6 = pnand %p174_p5, %p168_p2 }
  0x31   :  { %v112_v4 = vpop.eup %111 }
  0x32   :  { %v114_v6 = vpop.eup %113  ;;  %v45_v8 = vmul.f32 0.6931472, %v112_v4 }
  0x33   :  { %v116_v9 = vpop.eup %115  ;;  %v47_v10 = vmul.f32 0.6931472, %v114_v6 }
  0x34   :  { %v118_v11 = vpop.eup %117  ;;  %v48_v12 = vmax.f32 %v45_v8, -100.0  ;;  %v53_v13 = vmul.f32 0.6931472, %v116_v9 }
  0x35   :  { %v49_v15 = vmax.f32 %v47_v10, -100.0  ;;  %v55_v16 = vmul.f32 0.6931472, %v118_v11 }
  0x36   :  { %v56_v18 = vmax.f32 %v53_v13, -100.0  ;;  %v58_v19 = vmul.f32 %v48_v12, %v42_v5 }
  0x37   :  { %v57_v20 = vmax.f32 %v55_v16, -100.0  ;;  %v59_v21 = vmul.f32 %v49_v15, %v43_v7 }
  0x38   :  { %v62_v22 = vmul.f32 %v60_v14, %v56_v18 }
  0x39   :  { %v63_v23 = vmul.f32 %v61_v17, %v57_v20 }
  0x3a   :  { %v64_v24 = vadd.f32 %v62_v22, %v58_v19 }
  0x3b   :  { %v65_v25 = vadd.f32 %v63_v23, %v59_v21 }
  0x3c   :  { %v66_v26 = vsub.f32 0.0, %v64_v24 }
  0x3d   :  { %v67_v27 = vsub.f32 0.0, %v65_v25 }
  0x3e   :  { %v68_v28 = vsub.f32 0.0, %v66_v26 }
  0x3f   :  { %v69_v29 = vsub.f32 0.0, %v67_v27 }
  0x40   :  { %v70_v30 = vmul.f32 1.442695, %v68_v28 }
  0x41   :  { %v72_v31 = vmul.f32 1.442695, %v69_v29 }
  0x42   :  { %119 = vpow2.f32 %v70_v30 }
  0x43   :  { %121 = vpow2.f32 %v72_v31 }
  0x4c   :  { %v120_v32 = vpop.eup %119 }
  0x4d   :  { %v122_v33 = vpop.eup %121  ;;  %v74_v34 = vsub.f32 1.0, %v120_v32 }
  0x4e   :  { %v75_v35 = vsub.f32 1.0, %v122_v33 }
  0x4f   :  { %v76_v36 = vmul.f32 %v74_v34, %v74_v34 }
  0x50   :  { %v77_v37 = vmul.f32 %v75_v35, %v75_v35 }
  0x51   :  { %v78_v38 = vmul.f32 0.25, %v76_v36 }
  0x52   :  { %v79_v39 = vmul.f32 0.25, %v77_v37 }
  0x53   :  { %v80_v40 = vmul.f32 %v78_v38, %v66_v26 }
  0x54   :  { %v81_v41 = vmul.f32 %v79_v39, %v67_v27 }
  0x56   :  { %v82_v42 = vadd.f32 %v81_v41, %v80_v40 }
  0x58   :  { %v83_v43 = vrot.slane %v82_v42, 4 }
  0x5a   :  { %v84_v44 = vadd.f32 %v83_v43, %v82_v42 }
  0x5c   :  { %v85_v45 = vrot.slane %v84_v44, 2 }
  0x5e   :  { %v86_v46 = vadd.f32 %v85_v45, %v84_v44 }
  0x60   :  { %v87_v47 = vrot.slane %v86_v46, 1 }
  0x62   :  { %v88_v48 = vadd.f32 %v87_v47, %v86_v46 }
  0x64   :  { %89 = vst [vmem:[#allocation7] sm:$0x1] %v88_v48 }
  0x65   :  { %178 = shalt.err (!%p175_p6)
}
  0x66   :  { %s179_s11 = scalar_lea.hbm %s253_s2, 16 }
  0x67   :  { %p180_p7 = scmp.ne.s32.totalorder %s253_s2, %s179_s11  ;;  %p183_p8 = scmp.lt.u32.totalorder %s179_s11, %s253_s2 }
  0x69   :  { %p185_p9 = pnand %p183_p8, %p180_p7 }
  0x6b   :  { %188 = shalt.err (!%p185_p9)
}
  0x6c   :  { %99 = dma.vmem_to_hbm [thread:$0]  %s97_s6, 16, %s253_s2, [#allocation4]  }
  0x6d   :  { %193 = dma.done.wait [#allocation4], 16  }
  0x6e   :  { %194 = vsyncadd [#allocation4], 4294967280 }
  0x6f   :  { %103 = vsyncpa [#allocation3], 1 }
  0x70   :  { %104 = vsyncpa [#allocation6], 1 }
  0x71   :  { %105 = vsyncpa [#allocation4], 1 }

</bundles_post_ra>
